<compile_context>
chip_gen: v5e
topology: v5e:2x2
jax: 0.10.0
libtpu: 0.0.40
codegen_flags: <defaults>
</compile_context>

<pallas_src>
import functools

import jax
import jax.numpy as jnp
import numpy as np
from jax.experimental import pallas as pl
from jax.experimental.pallas import tpu as pltpu


def temporal_block_kernel(x_main_ref, x_left_ref, x_right_ref, w_ref, shift_ref,
                          o_ref, *, tt, hw):
    """One (batch, time-tile) grid step.

    x_main_ref:  (1, C, tt*hw)  bf16  frames [j*tt, (j+1)*tt)
    x_left_ref:  (1, C, hw)     bf16  frame j*tt - 1   (index clamped at t = 0)
    x_right_ref: (1, C, hw)     bf16  frame (j+1)*tt   (index clamped at t = T-1)
    w_ref:       (3, C, C)      bf16  conv taps with BN scale folded into C_out
    shift_ref:   (C, 1)         f32   folded BN shift
    o_ref:       (1, C, tt*hw)  f32   output block (doubles as f32 accumulator)
    """
    j = pl.program_id(1)
    nj = pl.num_programs(1)
    f32 = jnp.float32

    # Center tap (k=1) over the whole tile.
    o_ref[0] = jnp.dot(w_ref[1], x_main_ref[0], preferred_element_type=f32)

    # In-tile shifted taps: out[t] += w0 @ x[t-1] and out[t] += w2 @ x[t+1].
    # Offsets are multiples of hw (itself a multiple of 128 lanes), so these are
    # plain lane-aligned sub-block read-modify-writes — no concat/repack copies.
    if tt > 1:
        o_ref[0, :, hw:] = o_ref[0, :, hw:] + jnp.dot(
            w_ref[0], x_main_ref[0, :, : (tt - 1) * hw], preferred_element_type=f32)
        o_ref[0, :, : (tt - 1) * hw] = o_ref[0, :, : (tt - 1) * hw] + jnp.dot(
            w_ref[2], x_main_ref[0, :, hw:], preferred_element_type=f32)

    # Halo taps at the tile boundaries.  Skipped entirely at the sequence ends,
    # which is exactly the conv's zero temporal padding.
    @pl.when(j > 0)
    def _():
        o_ref[0, :, :hw] = o_ref[0, :, :hw] + jnp.dot(
            w_ref[0], x_left_ref[0], preferred_element_type=f32)

    @pl.when(j < nj - 1)
    def _():
        o_ref[0, :, (tt - 1) * hw:] = o_ref[0, :, (tt - 1) * hw:] + jnp.dot(
            w_ref[2], x_right_ref[0], preferred_element_type=f32)

    # Fused BN shift + ReLU, one full lane-dense pass / store.
    o_ref[0] = jnp.maximum(o_ref[0] + shift_ref[...], 0.0).astype(o_ref.dtype)


def _vmem_limit_and_budget():
    """Generation-aware scoped-VMEM limit and per-kernel working-set budget."""
    try:
        cap = pltpu.get_tpu_info().vmem_capacity_bytes   # 128 MiB v5e/v6e, 64 MiB v7x
    except Exception:
        cap = 64 << 20                                   # conservative fallback
    vmem_limit = max(32 << 20, min(int(cap * 0.75), 100 << 20))
    tile_budget = int(vmem_limit * 0.55)                 # headroom for dbl-buffering etc.
    return vmem_limit, tile_budget


def _choose_time_tile(T, B, C, HW, *, in_bytes, out_bytes, budget_bytes):
    """Largest time-tile whose full working set fits the budget, preferring
    >= 2 grid steps per TensorCore (even total) and minimal ragged-tail waste."""
    cdiv = lambda a, b: -(-a // b)

    def working_set(tt):
        tile = C * tt * HW
        return (tile * (2 * in_bytes + 2 * out_bytes)     # dbl-buffered main in + out(=acc)
                + 4 * C * HW * in_bytes                    # 2 halo frames, dbl-buffered
                + 6 * C * C * in_bytes + 2 * C * 4)        # weights + shift

    cands = [tt for tt in range(1, T + 1) if working_set(tt) <= budget_bytes]
    if not cands:
        # TODO(synk): add a spatial (lane) tiling fallback for very large C*HW frames.
        return 1

    def pipeline_ok(tt):
        steps = B * cdiv(T, tt)
        return steps >= 4 and steps % 2 == 0               # >=2 steps/TC, balanced on v7x

    pool = [tt for tt in cands if pipeline_ok(tt)] or cands
    # Rank: fewest grid steps, then least padded-tail waste, then largest tile.
    return min(pool, key=lambda tt: (cdiv(T, tt), cdiv(T, tt) * tt - T, -tt))


def temporal_block(x, w, gamma, beta, running_mean, running_var, eps=1e-5):
    """x: (B, T, C, H, W) float32.  Returns (B*T, C, H, W), matching the PyTorch
    module's forward (eval-mode BN)."""
    B, T, C, H, W = x.shape
    HW = H * W
    assert HW % 128 == 0, "H*W must be a multiple of 128 for lane-dense tiling"

    # torch: x.view(B, C, T, H, W) is a raw memory reinterpretation; collapsing
    # the last three dims is also free -> lane-dense (B, C, T*HW), cast to bf16.
    xf = x.reshape(B, C, T * HW).astype(jnp.bfloat16)

    # Fold BatchNorm3d (eval) into the conv: scale -> weights, shift -> bias.
    scale = (gamma / jnp.sqrt(running_var + eps)).astype(jnp.float32)           # (C,)
    shift = (beta - running_mean * scale).reshape(C, 1).astype(jnp.float32)     # (C, 1)
    w3 = jnp.transpose(w.reshape(C, C, 3), (2, 0, 1)).astype(jnp.float32)       # (3, Co, Ci)
    w3 = (w3 * scale[None, :, None]).astype(jnp.bfloat16)

    vmem_limit, tile_budget = _vmem_limit_and_budget()
    TT = _choose_time_tile(T, B, C, HW, in_bytes=2, out_bytes=4,
                           budget_bytes=tile_budget)
    J = -(-T // TT)
    T_pad = J * TT
    if T_pad != T:
        # Ragged tail: zero-pad time; zero frames reproduce the conv's zero padding
        # and the extra outputs are sliced off below.
        xf = jnp.pad(xf, ((0, 0), (0, 0), (0, (T_pad - T) * HW)))
    L_TILE = TT * HW

    kernel = functools.partial(temporal_block_kernel, tt=TT, hw=HW)

    out = pl.pallas_call(
        kernel,
        out_shape=jax.ShapeDtypeStruct((B, C, T_pad * HW), jnp.float32),
        grid_spec=pltpu.PrefetchScalarGridSpec(
            num_scalar_prefetch=0,
            grid=(B, J),
            in_specs=[
                # main body of the time tile
                pl.BlockSpec((1, C, L_TILE), lambda b, j: (b, 0, j)),
                # left halo frame (time j*TT - 1), clamped at the start
                pl.BlockSpec((1, C, HW),
                             lambda b, j: (b, 0, jnp.maximum(j * TT - 1, 0))),
                # right halo frame (time (j+1)*TT), clamped at the end
                pl.BlockSpec((1, C, HW),
                             lambda b, j: (b, 0, jnp.minimum((j + 1) * TT, T_pad - 1))),
                # conv taps (BN scale folded) and BN shift
                pl.BlockSpec((3, C, C), lambda b, j: (0, 0, 0)),
                pl.BlockSpec((C, 1), lambda b, j: (0, 0)),
            ],
            out_specs=pl.BlockSpec((1, C, L_TILE), lambda b, j: (b, 0, j)),
        ),
        compiler_params=pltpu.CompilerParams(
            dimension_semantics=("parallel", "parallel"),
            vmem_limit_bytes=vmem_limit),
    )(xf, xf, xf, w3, shift)

    out = out[:, :, : T * HW]
    # torch: x.view(B*T, C, H, W) on the contiguous (B, C, T, H, W) result.
    return out.reshape(B, C, T, H, W).reshape(B * T, C, H, W)


def ref_forward(x, w, gamma, beta, running_mean, running_var, eps=1e-5):
    """Pure-JAX f32 reference mirroring the PyTorch forward (eval-mode BN)."""
    B, T, C, H, W = x.shape
    x5 = x.reshape(B, C, T, H, W)
    xp = jnp.pad(x5, ((0, 0), (0, 0), (1, 1), (0, 0), (0, 0)))
    taps = jnp.stack([xp[:, :, k:k + T] for k in range(3)], axis=2)  # (B, Ci, 3, T, H, W)
    w3 = w.reshape(C, C, 3)                                          # (Co, Ci, 3)
    y = jnp.einsum('oik,bikthw->bothw', w3, taps)
    inv = 1.0 / jnp.sqrt(running_var + eps)
    bcast = lambda v: v[None, :, None, None, None]
    y = (y - bcast(running_mean)) * bcast(inv) * bcast(gamma) + bcast(beta)
    y = jnp.maximum(y, 0.0)
    return y.reshape(B * T, C, H, W)


if __name__ == "__main__":
    key = jax.random.PRNGKey(0)
    kx, kw, kg, kb, km, kv = jax.random.split(key, 6)

    # T != C so the torch-view-mimicking reshapes are actually exercised;
    # H*W = 256 keeps the spatial axis a multiple of 128 lanes.
    B, T, C, H, W = 2, 4, 8, 16, 16
    x = jax.random.normal(kx, (B, T, C, H, W), dtype=jnp.float32)

    # deterministic synthetic parameters (shapes from TemporalBlock.__init__)
    w = jax.random.normal(kw, (C, C, 3, 1, 1), dtype=jnp.float32) * 0.3
    gamma = jax.random.uniform(kg, (C,), minval=0.5, maxval=1.5, dtype=jnp.float32)
    beta = jax.random.normal(kb, (C,), dtype=jnp.float32) * 0.1
    running_mean = jax.random.normal(km, (C,), dtype=jnp.float32) * 0.1
    running_var = jax.random.uniform(kv, (C,), minval=0.5, maxval=1.5, dtype=jnp.float32)

    out = temporal_block(x, w, gamma, beta, running_mean, running_var)
    out = jax.block_until_ready(out)

    ref = ref_forward(x, w, gamma, beta, running_mean, running_var)
    assert out.shape == (B * T, C, H, W)
    # bf16 activations/weights with f32 accumulation -> bf16-level tolerance.
    np.testing.assert_allclose(np.asarray(out), np.asarray(ref), rtol=5e-2, atol=5e-2)

    print("KERNEL_OK")
</pallas_src>

<mosaic_0001>
module attributes {stable_mosaic.version = 11 : i64} {
  func.func @temporal_block_kernel(%arg0: i32, %arg1: i32, %arg2: memref<1x8x512xbf16, #tpu.memory_space<vmem>>, %arg3: memref<1x8x256xbf16, #tpu.memory_space<vmem>>, %arg4: memref<1x8x256xbf16, #tpu.memory_space<vmem>>, %arg5: memref<3x8x8xbf16, #tpu.memory_space<vmem>>, %arg6: memref<8x1xf32, #tpu.memory_space<vmem>>, %arg7: memref<1x8x512xf32, #tpu.memory_space<vmem>>) attributes {dimension_semantics = [#tpu.dimension_semantics<parallel>, #tpu.dimension_semantics<parallel>], iteration_bounds = array<i64: 2, 2>, scalar_prefetch = 0 : i64, scratch_operands = 0 : i64, tpu.core_type = #tpu.core_type<tc>, window_params = [{transform_indices = @transform_0, window_bounds = array<i64: 1, 8, 512>}, {transform_indices = @transform_1, window_bounds = array<i64: 1, 8, 256>}, {transform_indices = @transform_2, window_bounds = array<i64: 1, 8, 256>}, {pipeline_mode = #tpu.pipeline_mode<synchronous>, transform_indices = @transform_3, window_bounds = array<i64: 3, 8, 8>}, {pipeline_mode = #tpu.pipeline_mode<synchronous>, transform_indices = @transform_4, window_bounds = array<i64: 8, 1>}, {transform_indices = @transform_5, window_bounds = array<i64: 1, 8, 512>}]} {
    %c1 = arith.constant 1 : index
    %c0 = arith.constant 0 : index
    %c0_0 = arith.constant 0 : index
    %0 = vector.load %arg5[%c1, %c0, %c0_0] : memref<3x8x8xbf16, #tpu.memory_space<vmem>>, vector<1x8x8xbf16>
    %1 = vector.shape_cast %0 : vector<1x8x8xbf16> to vector<8x8xbf16>
    %c0_1 = arith.constant 0 : index
    %c0_2 = arith.constant 0 : index
    %c0_3 = arith.constant 0 : index
    %2 = vector.load %arg2[%c0_1, %c0_2, %c0_3] : memref<1x8x512xbf16, #tpu.memory_space<vmem>>, vector<1x8x512xbf16>
    %3 = vector.shape_cast %2 : vector<1x8x512xbf16> to vector<8x512xbf16>
    %cst = arith.constant dense<0.000000e+00> : vector<8x512xf32>
    %4 = tpu.matmul %1, %3, %cst {dimension_numbers = #tpu.dot_dimension_numbers<[1], [0], [0], [1], [0, 0, 1, 1], [], []>} : vector<8x8xbf16>, vector<8x512xbf16>, vector<8x512xf32> -> vector<8x512xf32>
    %c0_4 = arith.constant 0 : index
    %c0_5 = arith.constant 0 : index
    %c0_6 = arith.constant 0 : index
    %5 = vector.load %arg7[%c0_4, %c0_5, %c0_6] : memref<1x8x512xf32, #tpu.memory_space<vmem>>, vector<1x8x512xf32>
    %6 = vector.shape_cast %5 : vector<1x8x512xf32> to vector<8x512xf32>
    %7 = vector.shape_cast %4 : vector<8x512xf32> to vector<1x8x512xf32>
    tpu.vector_store %arg7[%c0_4, %c0_5, %c0_6], %7 {strides = array<i32>} : memref<1x8x512xf32, #tpu.memory_space<vmem>>, vector<1x8x512xf32>,
    %c0_7 = arith.constant 0 : index
    %c0_8 = arith.constant 0 : index
    %c256 = arith.constant 256 : index
    %8 = vector.load %arg7[%c0_7, %c0_8, %c256] : memref<1x8x512xf32, #tpu.memory_space<vmem>>, vector<1x8x256xf32>
    %9 = vector.shape_cast %8 : vector<1x8x256xf32> to vector<8x256xf32>
    %c0_9 = arith.constant 0 : index
    %c0_10 = arith.constant 0 : index
    %c0_11 = arith.constant 0 : index
    %10 = vector.load %arg5[%c0_9, %c0_10, %c0_11] : memref<3x8x8xbf16, #tpu.memory_space<vmem>>, vector<1x8x8xbf16>
    %11 = vector.shape_cast %10 : vector<1x8x8xbf16> to vector<8x8xbf16>
    %c0_12 = arith.constant 0 : index
    %c0_13 = arith.constant 0 : index
    %c0_14 = arith.constant 0 : index
    %12 = vector.load %arg2[%c0_12, %c0_13, %c0_14] : memref<1x8x512xbf16, #tpu.memory_space<vmem>>, vector<1x8x256xbf16>
    %13 = vector.shape_cast %12 : vector<1x8x256xbf16> to vector<8x256xbf16>
    %cst_15 = arith.constant dense<0.000000e+00> : vector<8x256xf32>
    %14 = tpu.matmul %11, %13, %cst_15 {dimension_numbers = #tpu.dot_dimension_numbers<[1], [0], [0], [1], [0, 0, 1, 1], [], []>} : vector<8x8xbf16>, vector<8x256xbf16>, vector<8x256xf32> -> vector<8x256xf32>
    %15 = arith.addf %9, %14 : vector<8x256xf32>
    %c0_16 = arith.constant 0 : index
    %c0_17 = arith.constant 0 : index
    %c256_18 = arith.constant 256 : index
    %16 = vector.load %arg7[%c0_16, %c0_17, %c256_18] : memref<1x8x512xf32, #tpu.memory_space<vmem>>, vector<1x8x256xf32>
    %17 = vector.shape_cast %16 : vector<1x8x256xf32> to vector<8x256xf32>
    %18 = vector.shape_cast %15 : vector<8x256xf32> to vector<1x8x256xf32>
    tpu.vector_store %arg7[%c0_16, %c0_17, %c256_18], %18 {strides = array<i32>} : memref<1x8x512xf32, #tpu.memory_space<vmem>>, vector<1x8x256xf32>,
    %c0_19 = arith.constant 0 : index
    %c0_20 = arith.constant 0 : index
    %c0_21 = arith.constant 0 : index
    %19 = vector.load %arg7[%c0_19, %c0_20, %c0_21] : memref<1x8x512xf32, #tpu.memory_space<vmem>>, vector<1x8x256xf32>
    %20 = vector.shape_cast %19 : vector<1x8x256xf32> to vector<8x256xf32>
    %c2 = arith.constant 2 : index
    %c0_22 = arith.constant 0 : index
    %c0_23 = arith.constant 0 : index
    %21 = vector.load %arg5[%c2, %c0_22, %c0_23] : memref<3x8x8xbf16, #tpu.memory_space<vmem>>, vector<1x8x8xbf16>
    %22 = vector.shape_cast %21 : vector<1x8x8xbf16> to vector<8x8xbf16>
    %c0_24 = arith.constant 0 : index
    %c0_25 = arith.constant 0 : index
    %c256_26 = arith.constant 256 : index
    %23 = vector.load %arg2[%c0_24, %c0_25, %c256_26] : memref<1x8x512xbf16, #tpu.memory_space<vmem>>, vector<1x8x256xbf16>
    %24 = vector.shape_cast %23 : vector<1x8x256xbf16> to vector<8x256xbf16>
    %cst_27 = arith.constant dense<0.000000e+00> : vector<8x256xf32>
    %25 = tpu.matmul %22, %24, %cst_27 {dimension_numbers = #tpu.dot_dimension_numbers<[1], [0], [0], [1], [0, 0, 1, 1], [], []>} : vector<8x8xbf16>, vector<8x256xbf16>, vector<8x256xf32> -> vector<8x256xf32>
    %26 = arith.addf %20, %25 : vector<8x256xf32>
    %c0_28 = arith.constant 0 : index
    %c0_29 = arith.constant 0 : index
    %c0_30 = arith.constant 0 : index
    %27 = vector.load %arg7[%c0_28, %c0_29, %c0_30] : memref<1x8x512xf32, #tpu.memory_space<vmem>>, vector<1x8x256xf32>
    %28 = vector.shape_cast %27 : vector<1x8x256xf32> to vector<8x256xf32>
    %29 = vector.shape_cast %26 : vector<8x256xf32> to vector<1x8x256xf32>
    tpu.vector_store %arg7[%c0_28, %c0_29, %c0_30], %29 {strides = array<i32>} : memref<1x8x512xf32, #tpu.memory_space<vmem>>, vector<1x8x256xf32>,
    %c0_i32 = arith.constant 0 : i32
    %30 = arith.cmpi sgt, %arg1, %c0_i32 : i32
    %31 = arith.extui %30 : i1 to i32
    %c0_i32_31 = arith.constant 0 : i32
    %32 = arith.cmpi ne, %31, %c0_i32_31 : i32
    scf.if %32 {
      %c0_42 = arith.constant 0 : index
      %c0_43 = arith.constant 0 : index
      %c0_44 = arith.constant 0 : index
      %46 = vector.load %arg7[%c0_42, %c0_43, %c0_44] : memref<1x8x512xf32, #tpu.memory_space<vmem>>, vector<1x8x256xf32>
      %47 = vector.shape_cast %46 : vector<1x8x256xf32> to vector<8x256xf32>
      %c0_45 = arith.constant 0 : index
      %c0_46 = arith.constant 0 : index
      %c0_47 = arith.constant 0 : index
      %48 = vector.load %arg5[%c0_45, %c0_46, %c0_47] : memref<3x8x8xbf16, #tpu.memory_space<vmem>>, vector<1x8x8xbf16>
      %49 = vector.shape_cast %48 : vector<1x8x8xbf16> to vector<8x8xbf16>
      %c0_48 = arith.constant 0 : index
      %c0_49 = arith.constant 0 : index
      %c0_50 = arith.constant 0 : index
      %50 = vector.load %arg3[%c0_48, %c0_49, %c0_50] : memref<1x8x256xbf16, #tpu.memory_space<vmem>>, vector<1x8x256xbf16>
      %51 = vector.shape_cast %50 : vector<1x8x256xbf16> to vector<8x256xbf16>
      %cst_51 = arith.constant dense<0.000000e+00> : vector<8x256xf32>
      %52 = tpu.matmul %49, %51, %cst_51 {dimension_numbers = #tpu.dot_dimension_numbers<[1], [0], [0], [1], [0, 0, 1, 1], [], []>} : vector<8x8xbf16>, vector<8x256xbf16>, vector<8x256xf32> -> vector<8x256xf32>
      %53 = arith.addf %47, %52 : vector<8x256xf32>
      %c0_52 = arith.constant 0 : index
      %c0_53 = arith.constant 0 : index
      %c0_54 = arith.constant 0 : index
      %54 = vector.load %arg7[%c0_52, %c0_53, %c0_54] : memref<1x8x512xf32, #tpu.memory_space<vmem>>, vector<1x8x256xf32>
      %55 = vector.shape_cast %54 : vector<1x8x256xf32> to vector<8x256xf32>
      %56 = vector.shape_cast %53 : vector<8x256xf32> to vector<1x8x256xf32>
      tpu.vector_store %arg7[%c0_52, %c0_53, %c0_54], %56 {strides = array<i32>} : memref<1x8x512xf32, #tpu.memory_space<vmem>>, vector<1x8x256xf32>,
    } else {
    }
    %c1_i32 = arith.constant 1 : i32
    %33 = arith.cmpi slt, %arg1, %c1_i32 : i32
    %34 = arith.extui %33 : i1 to i32
    %c0_i32_32 = arith.constant 0 : i32
    %35 = arith.cmpi ne, %34, %c0_i32_32 : i32
    scf.if %35 {
      %c0_42 = arith.constant 0 : index
      %c0_43 = arith.constant 0 : index
      %c256_44 = arith.constant 256 : index
      %46 = vector.load %arg7[%c0_42, %c0_43, %c256_44] : memref<1x8x512xf32, #tpu.memory_space<vmem>>, vector<1x8x256xf32>
      %47 = vector.shape_cast %46 : vector<1x8x256xf32> to vector<8x256xf32>
      %c2_45 = arith.constant 2 : index
      %c0_46 = arith.constant 0 : index
      %c0_47 = arith.constant 0 : index
      %48 = vector.load %arg5[%c2_45, %c0_46, %c0_47] : memref<3x8x8xbf16, #tpu.memory_space<vmem>>, vector<1x8x8xbf16>
      %49 = vector.shape_cast %48 : vector<1x8x8xbf16> to vector<8x8xbf16>
      %c0_48 = arith.constant 0 : index
      %c0_49 = arith.constant 0 : index
      %c0_50 = arith.constant 0 : index
      %50 = vector.load %arg4[%c0_48, %c0_49, %c0_50] : memref<1x8x256xbf16, #tpu.memory_space<vmem>>, vector<1x8x256xbf16>
      %51 = vector.shape_cast %50 : vector<1x8x256xbf16> to vector<8x256xbf16>
      %cst_51 = arith.constant dense<0.000000e+00> : vector<8x256xf32>
      %52 = tpu.matmul %49, %51, %cst_51 {dimension_numbers = #tpu.dot_dimension_numbers<[1], [0], [0], [1], [0, 0, 1, 1], [], []>} : vector<8x8xbf16>, vector<8x256xbf16>, vector<8x256xf32> -> vector<8x256xf32>
      %53 = arith.addf %47, %52 : vector<8x256xf32>
      %c0_52 = arith.constant 0 : index
      %c0_53 = arith.constant 0 : index
      %c256_54 = arith.constant 256 : index
      %54 = vector.load %arg7[%c0_52, %c0_53, %c256_54] : memref<1x8x512xf32, #tpu.memory_space<vmem>>, vector<1x8x256xf32>
      %55 = vector.shape_cast %54 : vector<1x8x256xf32> to vector<8x256xf32>
      %56 = vector.shape_cast %53 : vector<8x256xf32> to vector<1x8x256xf32>
      tpu.vector_store %arg7[%c0_52, %c0_53, %c256_54], %56 {strides = array<i32>} : memref<1x8x512xf32, #tpu.memory_space<vmem>>, vector<1x8x256xf32>,
    } else {
    }
    %c0_33 = arith.constant 0 : index
    %c0_34 = arith.constant 0 : index
    %c0_35 = arith.constant 0 : index
    %36 = vector.load %arg7[%c0_33, %c0_34, %c0_35] : memref<1x8x512xf32, #tpu.memory_space<vmem>>, vector<1x8x512xf32>
    %37 = vector.shape_cast %36 : vector<1x8x512xf32> to vector<8x512xf32>
    %c0_36 = arith.constant 0 : index
    %c0_37 = arith.constant 0 : index
    %38 = vector.load %arg6[%c0_36, %c0_37] : memref<8x1xf32, #tpu.memory_space<vmem>>, vector<8x1xf32>
    %39 = vector.broadcast %38 : vector<8x1xf32> to vector<8x512xf32>
    %40 = arith.addf %37, %39 : vector<8x512xf32>
    %cst_38 = arith.constant 0.000000e+00 : f32
    %41 = vector.broadcast %cst_38 : f32 to vector<8x512xf32>
    %42 = arith.maximumf %40, %41 : vector<8x512xf32>
    %c0_39 = arith.constant 0 : index
    %c0_40 = arith.constant 0 : index
    %c0_41 = arith.constant 0 : index
    %43 = vector.load %arg7[%c0_39, %c0_40, %c0_41] : memref<1x8x512xf32, #tpu.memory_space<vmem>>, vector<1x8x512xf32>
    %44 = vector.shape_cast %43 : vector<1x8x512xf32> to vector<8x512xf32>
    %45 = vector.shape_cast %42 : vector<8x512xf32> to vector<1x8x512xf32>
    tpu.vector_store %arg7[%c0_39, %c0_40, %c0_41], %45 {strides = array<i32>} : memref<1x8x512xf32, #tpu.memory_space<vmem>>, vector<1x8x512xf32>,
    return
  }
  func.func @transform_0(%arg0: i32, %arg1: i32) -> (i32, i32, i32) {
    %c0_i32 = arith.constant 0 : i32
    %c0_i32_0 = arith.constant 0 : i32
    return %arg0, %c0_i32, %arg1 : i32, i32, i32
  }
  func.func @transform_1(%arg0: i32, %arg1: i32) -> (i32, i32, i32) {
    %c2_i32 = arith.constant 2 : i32
    %0 = arith.muli %arg1, %c2_i32 : i32
    %c1_i32 = arith.constant 1 : i32
    %1 = arith.subi %0, %c1_i32 : i32
    %c0_i32 = arith.constant 0 : i32
    %2 = arith.maxsi %1, %c0_i32 : i32
    %c0_i32_0 = arith.constant 0 : i32
    %c0_i32_1 = arith.constant 0 : i32
    return %arg0, %c0_i32_0, %2 : i32, i32, i32
  }
  func.func @transform_2(%arg0: i32, %arg1: i32) -> (i32, i32, i32) {
    %c1_i32 = arith.constant 1 : i32
    %0 = arith.addi %arg1, %c1_i32 : i32
    %c2_i32 = arith.constant 2 : i32
    %1 = arith.muli %0, %c2_i32 : i32
    %c3_i32 = arith.constant 3 : i32
    %2 = arith.minsi %1, %c3_i32 : i32
    %c0_i32 = arith.constant 0 : i32
    %c0_i32_0 = arith.constant 0 : i32
    return %arg0, %c0_i32, %2 : i32, i32, i32
  }
  func.func @transform_3(%arg0: i32, %arg1: i32) -> (i32, i32, i32) {
    %c0_i32 = arith.constant 0 : i32
    %c0_i32_0 = arith.constant 0 : i32
    %c0_i32_1 = arith.constant 0 : i32
    %c0_i32_2 = arith.constant 0 : i32
    return %c0_i32, %c0_i32_0, %c0_i32_1 : i32, i32, i32
  }
  func.func @transform_4(%arg0: i32, %arg1: i32) -> (i32, i32) {
    %c0_i32 = arith.constant 0 : i32
    %c0_i32_0 = arith.constant 0 : i32
    %c0_i32_1 = arith.constant 0 : i32
    return %c0_i32, %c0_i32_0 : i32, i32
  }
  func.func @transform_5(%arg0: i32, %arg1: i32) -> (i32, i32, i32) {
    %c0_i32 = arith.constant 0 : i32
    %c0_i32_0 = arith.constant 0 : i32
    return %arg0, %c0_i32, %arg1 : i32, i32, i32
  }
}

</mosaic_0001>

<bundles_post_ra>
// kernel: tpu_custom_call.1
= control target key start
LH: loop header
LB: loop body
LE: loop exit
PB: predicated region body
PF: predicated region fallthrough
CT: control target
= control target key end

     0   :  { %s1781_s0 = inlined_call_operand.hbm [shape: bf16[2,8,1024], index: 0, kind: input, shape index: {}]   ;;  %s1782_s1 = inlined_call_operand.hbm [shape: bf16[2,8,1024], index: 1, kind: input, shape index: {}]   ;;  %s1783_s2 = inlined_call_operand.hbm [shape: bf16[2,8,1024], index: 2, kind: input, shape index: {}]   ;;  %s1784_s3 = inlined_call_operand.hbm [shape: bf16[3,8,8], index: 3, kind: input, shape index: {}]   ;;  %s1785_s4 = inlined_call_operand.vmem [shape: f32[8,1], index: 4, kind: input, shape index: {}]   ;;  %s1786_s5 = inlined_call_operand.hbm [shape: f32[2,8,1024], index: 5, kind: output, shape index: {}]  }
   0x1   :  { %1798 = sst [smem:[#allocation28_spill]] %s1781_s0 }
   0x2   :  { %1799 = sst [smem:[#allocation29_spill]] %s1782_s1 }
   0x3   :  { %1800 = sst [smem:[#allocation30_spill]] %s1783_s2 }
   0x4   :  { %1801 = sst [smem:[#allocation31_spill]] %s1784_s3 }
   0x5   :  { %1802 = sst [smem:[#allocation32_spill]] %s1785_s4 }
   0x6   :  { %1803 = sst [smem:[#allocation33_spill]] %s1786_s5 }
   0x7   :  { %10 = vsyncpa [#allocation3], 0 }
   0x8   :  { %12 = vsyncpa [#allocation3 + $0x1], 0 }
   0x9   :  { %13 = vsyncpa [#allocation6], 0 }
   0xa   :  { %15 = vsyncpa [#allocation6 + $0x1], 0 }
   0xb   :  { %16 = vsyncpa [#allocation9], 0 }
   0xc   :  { %17 = vsyncpa [#allocation4], 0 }
   0xd   :  { %19 = vsyncpa [#allocation4 + $0x1], 0  ;;  %s1398_s18 = smov 0   ;;  %s1400_s19 = smov 0  }
   0xe   :  { %s1402_s20 = smov 0   ;;  %s1404_s21 = smov 0  }
   0xf   :  { %s1406_s22 = smov 0   ;;  %s1408_s23 = smov 0  }
  0x10   :  { %s1410_s24 = smov 0   ;;  %s1412_s25 = smov 0  }
  0x11   :  { %s1414_s26 = smov 0   ;;  %s1416_s27 = smov 0  }
  0x12   :  { %s1418_s28 = smov 0   ;;  %s1420_s29 = smov 0  }
  0x13   :  { %s1422_s30 = smov 0   ;;  %s1424_s6 = smov 0  }
  0x14 LB: > { %1804 = sst [smem:[#allocation16_spill]] %s1326_s22  ;;  %s1469_s7 = sadd.s32 4294967295, %s1362_s6   ;;  %s1362_s6 = sphi %s1424_s6, %s25_s6   ;;  %s1358_s30 = sphi %s1422_s30, %s1850_s30   ;;  %s1354_s29 = sphi %s1420_s29, %s1849_s29   ;;  %s1350_s28 = sphi %s1418_s28, %s1848_s28   ;;  %s1346_s27 = sphi %s1416_s27, %s1847_s27   ;;  %s1342_s26 = sphi %s1414_s26, %s1846_s26   ;;  %s1338_s25 = sphi %s1412_s25, %s1857_s25   ;;  %s1334_s24 = sphi %s1410_s24, %s1856_s24   ;;  %s1330_s23 = sphi %s1408_s23, %s1855_s23   ;;  %s1326_s22 = sphi %s1406_s22, %s1854_s22   ;;  %s1322_s21 = sphi %s1404_s21, %s1843_s21   ;;  %s1318_s20 = sphi %s1402_s20, %s1853_s20   ;;  %s1314_s19 = sphi %s1400_s19, %s1852_s19   ;;  %s1310_s18 = sphi %s1398_s18, %s1851_s18  }
  0x15   : > { %1805 = sst [smem:[#allocation17_spill]] %s1342_s26  ;;  %s34_s8 = sadd.s32 1, %s1354_s29 }
  0x16   : > { %1806 = sst [smem:[#allocation18_spill]] %s1346_s27  ;;  %p35_p0 = scmp.ge.s32.totalorder %s34_s8, 2 }
  0x17   : > { %1807 = sst [smem:[#allocation19_spill]] %s1350_s28  ;;  %s37_s9 = sadd.s32 1, %s1358_s30 }
  0x18   : > { %1808 = sst [smem:[#allocation20_spill]] %s1354_s29  ;;  %p54_p1 = scmp.eq.s32.totalorder %s1362_s6, 0 }
  0x19   : > { %1809 = sst [smem:[#allocation21_spill]] %s1358_s30  ;;  %p60_p2 = scmp.eq.s32.totalorder %s1469_s7, 0 }
  0x1a   : > { %s1859_s8 = smov (%p35_p0, %s34_s8), 0  ;;  %s1861_s9 = smov (!%p35_p0, %s37_s9), %s1358_s30 }
  0x1b   : > { %1810 = sst [smem:[#allocation22_spill]] %s1859_s8  ;;  %s42_s10 = ssub.s32 %s1354_s29, %s1859_s8 }
  0x1c   : > { %s877_s11 = sshll.u32 %s1354_s29, 1  ;;  %p39_p3 = scmp.ge.s32.totalorder %s1861_s9, 2 }
  0x1d   : > { %s878_s12 = sadd.s32 4294967295, %s877_s11  ;;  %s879_s13 = sshll.u32 %s1859_s8, 1 }
  0x1e   : > { %p71_p4 = scmp.gt.s32.totalorder %s878_s12, 0  ;;  %s1863_s9 = smov (%p39_p3, %s1861_s9), 0 }
  0x1f   : > { %1811 = sst [smem:[#allocation23_spill]] %s1863_s9  ;;  %s1486_s14 = ssub.s32 %s1358_s30, %s1863_s9 }
  0x20   : > { %s1865_s12 = smov (!%p71_p4, %s878_s12), 0  ;;  %1812 = sst [smem:[#allocation24_spill]] %s1486_s14 }
  0x21   : > { %s880_s15 = sadd.s32 4294967295, %s879_s13  ;;  %s1489_s16 = sor.u32 %s42_s10, %s1486_s14 }
  0x22   : > { %p75_p5 = scmp.gt.s32.totalorder %s880_s15, 0  ;;  %p44_p6 = scmp.eq.s32.totalorder %s1489_s16, 0 }
  0x23   : > { %s82_s17 = sadd.s32 1, %s1330_s23  ;;  %p89_p7 = scmp.ne.s32.totalorder %s1330_s23, %s1326_s22 }
  0x24   : > { %s1867_s15 = smov (!%p75_p5, %s880_s15), 0  ;;  %p95_p8 = scmp.ne.s32.totalorder %s1326_s22, %s1322_s21 }
  0x25   : > { %s78_s8 = ssub.s32 %s1865_s12, %s1867_s15  ;;  %s1497_s9 = sadd.s32 2, %s877_s11 }
  0x26   : > { %s79_s5 = sor.u32 %s78_s8, %s1486_s14  ;;  %p1502_p9 = por %p89_p7, %p54_p1 }
  0x27   : > { %p80_p10 = scmp.eq.s32.totalorder %s79_s5, 0  ;;  %p1508_p11 = por %p95_p8, %p60_p2 }
  0x28   : > { %p107_p12 = scmp.lt.s32.totalorder %s1497_s9, 3  ;;  %s1513_s4 = sadd.s32 2, %s879_s13 }
  0x29   : > { %s1814_s28 = scalar_select %p1508_p11, 1, 0 }
  0x2a   : > { %s1516_s21 = scalar_select %p80_p10, %s1330_s23, %s82_s17  }
  0x2b   : > { %1815 = sst [smem:[#allocation25_spill]] %s1814_s28  ;;  %p1797_p0 = scmp.lt.s32.totalorder %s1362_s6, 4 }
  0x2c   : > { %1816 = sst [smem:[#allocation26_spill]] %s1516_s21  ;;  %s1521_s8 = sshll.u32 %s1358_s30, 3 }
  0x2d   : > { %s264_s5 = sand.u32 1, %s1362_s6   ;;  %s266_s11 = sand.u32 1, %s1330_s23  }
  0x2e   : > { %s890_s15 = sshll.u32 %s266_s11, 3  ;;  %s893_s27 = sshll.u32 %s1865_s12, 1 }
  0x2f   : > { %s277_s28 = sadd.s32 %s893_s27, %s1521_s8  ;;  %s268_s13 = scalar_lea.vmem [#allocation5], %s890_s15 }
  0x30   : > { %s895_s22 = sshll.u32 %s277_s28, 2  ;;  %s283_s2 = sshll.u32 %s268_s13, 4  ;;  %s284_s2 = int_to_ptr.vmem [resolvable:$true] %s283_s2 }
  0x31   : > { %s1817_s1 = sld [smem:[#allocation29_spill]]  ;;  %p953_p3 = pnand %p1797_p0, %p1502_p9 }
  0x32   : > { %s1533_s30 = scalar_lea.sflag [#allocation6], %s264_s5  ;;  %p883_p4 = scmp.ge.s32.totalorder %s1362_s6, 1 }
  0x33   : > { %p212_p5 = scmp.lt.s32.totalorder %s1362_s6, 5  ;;  %s1818_s3 = sld [smem:[#allocation31_spill]] }
  0x34   : > { %s1365_s14 = smov 64   ;;  %s1366_s10 = smov 4  }
  0x35   : > { %p1541_p7 = pnand %p883_p4, %p212_p5  ;;  %s46_s5 = sadd.s32 1, %s1342_s26 }
  0x36   : > { %p53_p10 = scmp.ne.s32.totalorder %s1342_s26, %s1338_s25  ;;  %p59_p4 = scmp.ne.s32.totalorder %s1338_s25, %s1334_s24 }
  0x37   : > { %s279_s17 = scalar_lea.hbm %s1817_s1, %s895_s22  ;;  %p945_p8 = pneg %p1541_p7 }
  0x38   : > { %s281_s21 = sshll.u32 %s279_s17, 4  ;;  %p199_p5 = scmp.eq.s32.totalorder %s1469_s7, 3  ;;  %s282_s21 = int_to_ptr.hbm [resolvable:$true] %s281_s21 }
  0x39   : > { %955 = dma.hbm_to_vmem [thread:$0]  (!%p953_p3), %s282_s21, 128, %s284_s2, %s1533_s30  }
  0x3a   : > { %s223_s27 = sshll.u32 %s1818_s3, 4  ;;  %s1364_s2 = smov [#allocation8]   ;;  %s224_s27 = int_to_ptr.hbm [resolvable:$true] %s223_s27 }
  0x3b   : > { %s225_s12 = sshll.u32 %s1364_s2, 4  ;;  %p946_p9 = pnand %p945_p8, %p60_p2  ;;  %s226_s12 = int_to_ptr.vmem [resolvable:$true] %s225_s12 }
  0x3c   : > { %s876_s21 = sadd.s32 4294967294, %s1362_s6   ;;  %p1560_p3 = por %p54_p1, %p53_p10 }
  0x3d   : > { %948 = dma.hbm_to_vmem [thread:$0]  (!%p946_p9), %s224_s27, 192, %s226_s12, [#allocation9], %s1365_s14, %s1365_s14, %s1366_s10  }
  0x3e   : > { %s1556_s11 = scalar_select %p44_p6, %s1342_s26, %s46_s5  }
  0x3f   : > { %p205_p8 = scmp.eq.s32.totalorder %s876_s21, 3  ;;  %p1569_p13 = por %p60_p2, %p59_p4 }
  0x40   : > { %1820 = sst [smem:[#allocation27_spill]] %s1556_s11  ;;  %s242_s17 = sand.u32 1, %s1342_s26  }
  0x41   : > { %p1574_p9 = por %p199_p5, %p53_p10  ;;  %p1578_p6 = por %p205_p8, %p59_p4 }
  0x42   : > { %s886_s22 = sshll.u32 %s242_s17, 4  ;;  %s887_s27 = sshll.u32 %s1354_s29, 2 }
  0x43   : > { %s251_s2 = sadd.s32 %s1521_s8, %s887_s27  ;;  %s246_s12 = scalar_lea.vmem [#allocation2], %s886_s22 }
  0x44   : > { %s257_s14 = sshll.u32 %s246_s12, 4  ;;  %s1825_s10 = sld [smem:[#allocation24_spill]]  ;;  %s258_s14 = int_to_ptr.vmem [resolvable:$true] %s257_s14 }
  0x45   : > { %s889_s21 = sshll.u32 %s251_s2, 2  ;;  %s1826_s3 = sld [smem:[#allocation28_spill]] }
  0x46   : > { %p950_p10 = pnand %p1797_p0, %p1560_p3  ;;  %s243_s29 = scalar_lea.sflag [#allocation3], %s242_s17 }
  0x47   : > { %s118_s22 = sadd.s32 1, %s1318_s20  ;;  %s1869_s9 = smov (!%p107_p12, %s1497_s9), 3 }
  0x48   : > { %p1827_p4 = scmp.lt.s32.totalorder %s1513_s4, 3  ;;  %p125_p5 = scmp.ne.s32.totalorder %s1318_s20, %s1314_s19 }
  0x49   : > { %p131_p8 = scmp.ne.s32.totalorder %s1314_s19, %s1310_s18  ;;  %s292_s1 = sand.u32 1, %s1318_s20  }
  0x4a   : > { %s1871_s4 = smov (!%p1827_p4, %s1513_s4), 3  ;;  %p1606_p3 = por %p125_p5, %p54_p1 }
  0x4b   : > { %s253_s11 = scalar_lea.hbm %s1826_s3, %s889_s21  ;;  %s114_s27 = ssub.s32 %s1869_s9, %s1871_s4 }
  0x4c   : > { %s255_s26 = sshll.u32 %s253_s11, 4  ;;  %s115_s3 = sor.u32 %s114_s27, %s1825_s10  ;;  %s256_s26 = int_to_ptr.hbm [resolvable:$true] %s255_s26 }
  0x4d   : > { %952 = dma.hbm_to_vmem [thread:$0]  (!%p950_p10), %s256_s26, 256, %s258_s14, %s243_s29  }
  0x4e   : > { %p116_p0 = scmp.eq.s32.totalorder %s115_s3, 0  ;;  %p1612_p10 = por %p131_p8, %p60_p2 }
  0x4f   : > { %s896_s29 = sshll.u32 %s292_s1, 3  ;;  %s898_s15 = sshll.u32 %s1869_s9, 1 }
  0x50   : > { %s1617_s18 = scalar_select %p116_p0, %s1318_s20, %s118_s22  }
  0x51   : > { %s303_s4 = sadd.s32 %s898_s15, %s1521_s8  ;;  %s294_s2 = scalar_lea.vmem [#allocation7], %s896_s29 }
  0x52   : > { %s900_s17 = sshll.u32 %s303_s4, 2  ;;  %s309_s12 = sshll.u32 %s294_s2, 4  ;;  %s310_s12 = int_to_ptr.vmem [resolvable:$true] %s309_s12 }
  0x53   : > { %s1830_s21 = sld [smem:[#allocation30_spill]]  ;;  %p1831_p1 = scmp.lt.s32.totalorder %s1362_s6, 4 }
  0x54   : > { %s1631_s9 = sand.u32 (!%p1541_p7), 1, %s1338_s25  }
  0x55   : > { %p956_p12 = pnand %p1831_p1, %p1606_p3  ;;  %s902_s8 = sshll.u32 (!%p1541_p7), %s1631_s9, 4 }
  0x56   : > { %s321_s22 = scalar_lea.sflag (!%p1541_p7), [#allocation3], %s1631_s9  ;;  %s324_s1 = scalar_lea.vmem (!%p1541_p7), [#allocation2], %s902_s8 }
  0x57   : > { %318 = sbr.rel (%p1541_p7) target bundleno = 706 (0x2c2), region = 40 }
  0x59   : > { %s305_s5 = scalar_lea.hbm %s1830_s21, %s900_s17 }
  0x5a   : > { %s307_s27 = sshll.u32 %s305_s5, 4  ;;  %s308_s27 = int_to_ptr.hbm [resolvable:$true] %s307_s27 }
  0x5b   : > { %958 = dma.hbm_to_vmem [thread:$0]  (!%p956_p12), %s308_s27, 128, %s310_s12, %s1533_s30  }
  0x5c   : > { %1289 = dma.done.wait (%p1569_p13), %s321_s22, 256  }
  0x5d   : > { %1291 = vsyncadd (%p1569_p13), %s321_s22, 4294967040  ;;  %s1832_s3 = sld [smem:[#allocation16_spill]]  ;;  %s330_s11 = sand.u32 1, %s1469_s7  }
  0x5e   : > { %s331_s15 = scalar_lea.sflag [#allocation6], %s330_s11 }
  0x63   : > { %s332_s28 = sand.u32 1, %s1832_s3  }
  0x64   : > { %s1641_s29 = sshll.u32 %s332_s28, 3 }
  0x65   : > { %s334_s4 = scalar_lea.vmem [#allocation5], %s1641_s29 }
  0x66   : > { %1293 = dma.done.wait (%p1508_p11), %s331_s15, 128  }
  0x67   : > { %1295 = vsyncadd (%p1508_p11), %s331_s15, 4294967168  ;;  %s342_s17 = sand.u32 1, %s1314_s19  }
  0x68   : > { %s1649_s13 = sshll.u32 %s342_s17, 3 }
  0x69   : > { %s344_s2 = scalar_lea.vmem [#allocation7], %s1649_s13 }
  0x6a   : > { %1297 = dma.done.wait (%p1612_p10), %s331_s15, 128  }
  0x6b   : > { %1299 = vsyncadd (%p1612_p10), %s331_s15, 4294967168 }
  0x6c   : > { %1301 = dma.done.wait (%p60_p2), [#allocation9], 192  }
  0x6d   : > { %1303 = vsyncadd (%p60_p2), [#allocation9], 4294967104  ;;  %v402_v0 = vld [vmem:[%s324_s1] sm:$0xff]  ;;  %v403_v1 = vld [vmem:[%s324_s1 + $0x8] sm:$0xff]  ;;  %vm418_vm0 = vcmask 1043456   ;;  %vm414_vm1 = vcmask 64512  }
  0x6e   : > { %v406_v2 = vunpack.c.l.b16 %v402_v0  ;;  %v407_v3 = vunpack.c.h.b16 %v402_v0  ;;  %v408_v4 = vunpack.c.l.b16 %v403_v1  ;;  %v409_v5 = vunpack.c.h.b16 %v403_v1  ;;  %v401_v14 = vld [vmem:[#allocation8 + $0x4] sm:$0xf]  ;;  %v489_v15 = vld [vmem:[#allocation8] sm:$0xf]  ;;  %v538_v16 = vld [vmem:[#allocation8 + $0x8] sm:$0xf] }
  0x6f   : > { %s906_s7 = sshll.u32 %s1631_s9, 5  ;;  %s1834_s12 = sld [smem:[#allocation18_spill]] }
  0x70   : > { %v410_v6 = vpack.c.b16 %v406_v2, %v406_v2  ;;  %v411_v7 = vpack.c.b16 %v407_v3, %v407_v3  ;;  %v412_v8 = vpack.c.b16 %v408_v4, %v408_v4  ;;  %v413_v9 = vpack.c.b16 %v409_v5, %v409_v5  ;;  %s1673_s26 = scalar_lea.vmem [#allocation10], %s906_s7 }
  0x72   : > { %v420_v10 = vsel %vm418_vm0, %v410_v6, 0  ;;  %v423_v11 = vsel %vm418_vm0, %v411_v7, 0  ;;  %v426_v12 = vsel %vm418_vm0, %v412_v8, 0  ;;  %v429_v13 = vsel %vm418_vm0, %v413_v9, 0 }
  0x73   : > { %438 = vmatpush.bf16.msra.mxu0 %v420_v10  ;;  %451 = vmatpush.bf16.msra.mxu1 %v423_v11 }
  0x74   : > { %464 = vmatpush.bf16.msra.mxu2 %v426_v12  ;;  %477 = vmatpush.bf16.msra.mxu3 %v429_v13 }
  0x75   : > { %p915_p2 = scmp.le.s32.totalorder %s1834_s12, 0 }
  0x76   : > { %907 = vmatmul.msk.bf16.vlgmr.msra.gmra.mxu0 %vm414_vm1, %v401_v14  ;;  %908 = vmatmul.msk.bf16.vlgmr.msra.gmra.mxu1 %vm414_vm1, %v401_v14 }
  0x77   : > { %909 = vmatmul.msk.bf16.vlgmr.msra.gmra.mxu2 %vm414_vm1, %v401_v14  ;;  %910 = vmatmul.msk.bf16.vlgmr.msra.gmra.mxu3 %vm414_vm1, %v401_v14 }
  0x78   : > { %561 = vmatpush.bf16.msrb.mxu2 %v426_v12  ;;  %574 = vmatpush.bf16.msrb.mxu3 %v429_v13 }
  0x79   : > { %512 = vmatpush.bf16.msrb.mxu0 %v420_v10  ;;  %525 = vmatpush.bf16.msrb.mxu1 %v423_v11 }
  0x86   : > { %911 = vmatmul.msk.bf16.vlgmr.msrb.gmra.mxu0 %vm414_vm1, %v489_v15  ;;  %912 = vmatmul.msk.bf16.vlgmr.msrb.gmra.mxu1 %vm414_vm1, %v489_v15 }
  0x87   : > { %913 = vmatmul.msk.bf16.vlgmr.msrb.gmra.mxu2 %vm414_vm1, %v538_v16  ;;  %914 = vmatmul.msk.bf16.vlgmr.msrb.gmra.mxu3 %vm414_vm1, %v538_v16 }
  0xf3   : > { %v440_v17 = vpop.f32.mrf.mxu0  ;;  %v453_v18 = vpop.f32.mrf.mxu1 }
  0xfa   : > { %v466_v19 = vpop.f32.mrf.mxu2  ;;  %v479_v20 = vpop.f32.mrf.mxu3 }
  0xfb   : > { %v442_v21 = vpop.f32.mrf.mxu0  ;;  %v455_v22 = vpop.f32.mrf.mxu1 }
 0x102   : > { %v468_v23 = vpop.f32.mrf.mxu2  ;;  %v481_v24 = vpop.f32.mrf.mxu3 }
 0x103   : > { %v514_v25 = vpop.f32.mrf.mxu0  ;;  %v527_v26 = vpop.f32.mrf.mxu1 }
 0x104   : > { %v531_v27 = vadd.f32 %v514_v25, %v466_v19  ;;  %v532_v28 = vadd.f32 %v527_v26, %v479_v20 }
 0x106   : > { %533 = vst [vmem:[%s1673_s26 + $0x10] sm:$0xff] %v531_v27 }
 0x107   : > { %534 = vst [vmem:[%s1673_s26 + $0x18] sm:$0xff] %v532_v28 }
 0x10a   : > { %v563_v29 = vpop.f32.mrf.mxu2  ;;  %v576_v30 = vpop.f32.mrf.mxu3 }
 0x10b   : > { %v580_v31 = vadd.f32 %v563_v29, %v440_v17  ;;  %v581_v32 = vadd.f32 %v576_v30, %v453_v18  ;;  %v516_v33 = vpop.f32.mrf.mxu0  ;;  %v529_v34 = vpop.f32.mrf.mxu1 }
 0x10d   : > { %582 = vst [vmem:[%s1673_s26] sm:$0xff] %v580_v31 }
 0x10e   : > { %583 = vst [vmem:[%s1673_s26 + $0x8] sm:$0xff] %v581_v32  ;;  %587 = sbr.rel (%p915_p2) target bundleno = 418 (0x1a2), region = 60 }
 0x112   : > { %v565_v35 = vpop.f32.mrf.mxu2  ;;  %v578_v36 = vpop.f32.mrf.mxu3 }
 0x113   : > { %v591_v37 = vld [vmem:[%s334_s4] sm:$0xff] }
 0x114   : > { %v593_v38 = vunpack.c.l.b16 %v591_v37  ;;  %v594_v39 = vunpack.c.h.b16 %v591_v37  ;;  %v590_v44 = vld [vmem:[#allocation8] sm:$0xf]  ;;  %v588_v45 = vld [vmem:[%s1673_s26] sm:$0xff] }
 0x115   : > { %v589_v46 = vld [vmem:[%s1673_s26 + $0x8] sm:$0xff] }
 0x116   : > { %v595_v40 = vpack.c.b16 %v593_v38, %v593_v38  ;;  %v596_v41 = vpack.c.b16 %v594_v39, %v594_v39 }
 0x118   : > { %v601_v42 = vsel %vm418_vm0, %v595_v40, 0  ;;  %v604_v43 = vsel %vm418_vm0, %v596_v41, 0 }
 0x119   : > { %613 = vmatpush.bf16.msra.mxu0 %v601_v42  ;;  %626 = vmatpush.bf16.msra.mxu1 %v604_v43 }
 0x11c   : > { %916 = vmatmul.msk.bf16.vlgmr.msra.gmra.mxu0 %vm414_vm1, %v590_v44  ;;  %917 = vmatmul.msk.bf16.vlgmr.msra.gmra.mxu1 %vm414_vm1, %v590_v44 }
 0x199   : > { %v615_v47 = vpop.f32.mrf.mxu0  ;;  %v628_v48 = vpop.f32.mrf.mxu1 }
 0x19a   : > { %v632_v49 = vadd.f32 %v615_v47, %v588_v45  ;;  %v633_v50 = vadd.f32 %v628_v48, %v589_v46 }
 0x19c   : > { %634 = vst [vmem:[%s1673_s26] sm:$0xff] %v632_v49 }
 0x19d   : > { %635 = vst [vmem:[%s1673_s26 + $0x8] sm:$0xff] %v633_v50 }
 0x1a1   : > { %v617_v51 = vpop.f32.mrf.mxu0  ;;  %v630_v52 = vpop.f32.mrf.mxu1 }
 0x1a2 PF: > { %s1835_s14 = sld [smem:[#allocation18_spill]] }
 0x1a8   : > { %p918_p11 = scmp.ge.s32.totalorder %s1835_s14, 1 }
 0x1aa   : > { %639 = sbr.rel (%p918_p11) target bundleno = 574 (0x23e), region = 64 }
 0x1af   : > { %v643_v53 = vld [vmem:[%s344_s2] sm:$0xff]  ;;  %v642_v60 = vld [vmem:[#allocation8 + $0x8] sm:$0xf] }
 0x1b0   : > { %v645_v54 = vunpack.c.l.b16 %v643_v53  ;;  %v646_v55 = vunpack.c.h.b16 %v643_v53  ;;  %v640_v61 = vld [vmem:[%s1673_s26 + $0x10] sm:$0xff]  ;;  %v641_v62 = vld [vmem:[%s1673_s26 + $0x18] sm:$0xff] }
 0x1b2   : > { %v647_v56 = vpack.c.b16 %v645_v54, %v645_v54  ;;  %v648_v57 = vpack.c.b16 %v646_v55, %v646_v55 }
 0x1b4   : > { %v653_v58 = vsel %vm418_vm0, %v647_v56, 0  ;;  %v656_v59 = vsel %vm418_vm0, %v648_v57, 0 }
 0x1b5   : > { %665 = vmatpush.bf16.msra.mxu0 %v653_v58  ;;  %678 = vmatpush.bf16.msra.mxu1 %v656_v59 }
 0x1b8   : > { %919 = vmatmul.msk.bf16.vlgmr.msra.gmra.mxu0 %vm414_vm1, %v642_v60  ;;  %920 = vmatmul.msk.bf16.vlgmr.msra.gmra.mxu1 %vm414_vm1, %v642_v60 }
 0x235   : > { %v667_v63 = vpop.f32.mrf.mxu0  ;;  %v680_v0 = vpop.f32.mrf.mxu1 }
 0x236   : > { %v684_v1 = vadd.f32 %v667_v63, %v640_v61  ;;  %v685_v2 = vadd.f32 %v680_v0, %v641_v62 }
 0x238   : > { %686 = vst [vmem:[%s1673_s26 + $0x10] sm:$0xff] %v684_v1 }
 0x239   : > { %687 = vst [vmem:[%s1673_s26 + $0x18] sm:$0xff] %v685_v2 }
 0x23d   : > { %v669_v3 = vpop.f32.mrf.mxu0  ;;  %v682_v4 = vpop.f32.mrf.mxu1 }
 0x23e PF: > { %s1836_s5 = sld [smem:[#allocation32_spill]]  ;;  %v1367_v6 = vmov 0   ;;  %v688_v7 = vld [vmem:[%s1673_s26] sm:$0xff]  ;;  %v689_v8 = vld [vmem:[%s1673_s26 + $0x8] sm:$0xff]  ;;  %s726_s17 = sshll.u32 %s1673_s26, 4  ;;  %s727_s17 = int_to_ptr.vmem [resolvable:$true] %s726_s17 }
 0x23f   : > { %s1837_s27 = sld [smem:[#allocation18_spill]]  ;;  %1083 = vset.pattern.permute.xlu0 %v1367_v6  ;;  %v690_v9 = vld [vmem:[%s1673_s26 + $0x10] sm:$0xff]  ;;  %s711_s2 = scalar_lea.sflag [#allocation4], %s1631_s9 }
 0x240   : > { %s1838_s8 = sld [smem:[#allocation19_spill]]  ;;  %v691_v10 = vld [vmem:[%s1673_s26 + $0x18] sm:$0xff] }
 0x241   : > { %s1839_s29 = sld [smem:[#allocation33_spill]] }
 0x244   : > { %v692_v5 = vld [vmem:[%s1836_s5] sm:$0xff] }
 0x245   : > { %695 = vperm.xlu0 %1083, %v692_v5   ;;  %s922_s22 = sshll.u32 %s1837_s27, 2 }
 0x246   : > { %s923_s1 = sshll.u32 %s1838_s8, 3 }
 0x247   : > { %s722_s3 = sadd.s32 %s923_s1, %s922_s22  ;;  %s1840_s15 = smov %s1839_s29 }
 0x248   : > { %s924_s30 = sshll.u32 %s722_s3, 3  ;;  %s1224_s21 = scalar_lea.hbm %s1840_s15, 128 }
 0x249   : > { %s724_s4 = scalar_lea.hbm %s1839_s29, %s924_s30 }
 0x24a   : > { %s728_s13 = sshll.u32 %s724_s4, 4  ;;  %s729_s13 = int_to_ptr.hbm [resolvable:$true] %s728_s13 }
 0x24b   : > { %s1218_s7 = sshra.s32 %s729_s13, 4  ;;  %s1219_s7 = int_to_ptr.hbm [resolvable:$true] %s1218_s7 }
 0x24c   : > { %s1220_s12 = scalar_lea.hbm %s1219_s7, 32  ;;  %p1225_p4 = scmp.lt.s32.totalorder %s1219_s7, %s1840_s15 }
 0x24d   : > { %p1221_p13 = scmp.ne.s32.totalorder %s1219_s7, %s1220_s12  ;;  %p1226_p5 = scmp.lt.s32.totalorder %s1224_s21, %s1220_s12 }
 0x24f   : > { %p1222_p0 = pnand %p1221_p13, %p1574_p9  ;;  %p1227_p8 = por %p1226_p5, %p1225_p4 }
 0x251   : > { %p1223_p7 = pneg %p1222_p0 }
 0x253   : > { %p1228_p3 = pnand %p1227_p8, %p1223_p7 }
 0x2b7   : > { %v696_v11 = vpop.permute.xlu0 %695 }
 0x2b8   : > { %v698_v12 = vadd.f32 %v696_v11, %v688_v7  ;;  %v699_v13 = vadd.f32 %v696_v11, %v689_v8  ;;  %v700_v14 = vadd.f32 %v696_v11, %v690_v9  ;;  %v701_v15 = vadd.f32 %v696_v11, %v691_v10 }
 0x2ba   : > { %v702_v16 = vmax.f32 %v698_v12, 0.0  ;;  %v703_v17 = vmax.f32 %v699_v13, 0.0  ;;  %v704_v18 = vmax.f32 %v700_v14, 0.0  ;;  %v705_v19 = vmax.f32 %v701_v15, 0.0 }
 0x2bc   : > { %706 = vst [vmem:[%s1673_s26] sm:$0xff] %v702_v16 }
 0x2bd   : > { %707 = vst [vmem:[%s1673_s26 + $0x8] sm:$0xff] %v703_v17 }
 0x2be   : > { %708 = vst [vmem:[%s1673_s26 + $0x10] sm:$0xff] %v704_v18 }
 0x2bf   : > { %709 = vst [vmem:[%s1673_s26 + $0x18] sm:$0xff] %v705_v19 }
 0x2c0   : > { %1231 = shalt.err (!%p1228_p3)
}
 0x2c1   : > { %943 = dma.vmem_to_hbm [thread:$0]  (%p1574_p9), %s727_s17, 512, %s729_s13, %s711_s2  }
 0x2c2 PF: > { %p966_p10 = scmp.ge.s32.totalorder %s1362_s6, 2  ;;  %s740_s9 = sand.u32 1, %s1334_s24  }
 0x2c3   : > { %s741_s26 = scalar_lea.sflag [#allocation4], %s740_s9 }
 0x2c4   : > { %p960_p1 = pnand %p966_p10, %p1578_p6 }
 0x2c6   : > { %p961_p12 = pneg %p960_p1 }
 0x2c8   : > { %1305 = dma.done.wait (%p961_p12), %s741_s26, 512  }
 0x2c9   : > { %1307 = vsyncadd (%p961_p12), %s741_s26, 4294966784  ;;  %s25_s6 = sadd.s32 1, %s1362_s6   ;;  %s1842_s16 = smov %s1617_s18 }
 0x2ca   : > { %p1734_p2 = scmp.ge.s32.totalorder %s25_s6, 6   ;;  %s1843_s21 = sld [smem:[#allocation16_spill]] }
 0x2cb   : > { %s1844_s1 = sld [smem:[#allocation26_spill]]  ;;  %s1851_s18 = smov %s1314_s19 }
 0x2cc   : > { %s1845_s3 = sld [smem:[#allocation17_spill]]  ;;  %s1852_s19 = smov %s1318_s20 }
 0x2cd   : > { %s1846_s26 = sld [smem:[#allocation27_spill]]  ;;  %s1853_s20 = smov %s1842_s16 }
 0x2ce   : > { %s1847_s27 = sld [smem:[#allocation20_spill]]  ;;  %s1854_s22 = smov %s1330_s23 }
 0x2cf   : > { %s1848_s28 = sld [smem:[#allocation21_spill]]  ;;  %s1856_s24 = smov %s1338_s25 }
 0x2d0   : > { %s1849_s29 = sld [smem:[#allocation22_spill]]  ;;  %24 = sbr.rel (!%p1734_p2) target bundleno = 20 (0x14), region = 123 }
 0x2d1   : > { %s1850_s30 = sld [smem:[#allocation23_spill]]  ;;  %s1855_s23 = smov %s1844_s1 }
 0x2d2   : > { %s1857_s25 = smov %s1845_s3 }
 0x2d5   :  { %747 = vsyncpa [#allocation3], 1 }
 0x2d6   :  { %749 = vsyncpa [#allocation3 + $0x1], 1 }
 0x2d7   :  { %750 = vsyncpa [#allocation6], 1 }
 0x2d8   :  { %752 = vsyncpa [#allocation6 + $0x1], 1 }
 0x2d9   :  { %753 = vsyncpa [#allocation9], 1 }
 0x2da   :  { %754 = vsyncpa [#allocation4], 1 }
 0x2db   :  { %756 = vsyncpa [#allocation4 + $0x1], 1 }

</bundles_post_ra>
